<compile_context>
chip_gen: v7x
topology: tpu7x:2x2x1
jax: 0.10.0
libtpu: 0.0.40
codegen_flags: <defaults>
</compile_context>

<pallas_src>
import functools

import jax
import jax.numpy as jnp
from jax import lax
from jax.experimental import pallas as pl
from jax.experimental.pallas import tpu as pltpu

INPUT_SIZE = 5        # feature columns after customize_dataset drops 'region'
OUTPUT_SIZE = 1       # ['charges']

_LANE_CHUNK = 1024    # lanes per inner-loop chunk (bounds vreg pressure)
_SMALL_B = 1024       # up to this batch: single grid step, full-array blocks
_MAX_TILE_LANES = 65536  # per-step lanes at large B:
                         #   in  (8-sublane-padded, 64K lanes) f32 = 2 MiB x 2 bufs
                         #   out (1 -> 8 sublane,   64K lanes) f32 = 2 MiB x 2 bufs
                         #   total ~8 MiB  -> fits v5e's 16 MiB scoped-VMEM default,
                         #   and v6e/v7x 32 MiB, no vmem_limit_bytes override needed.


def _fma_row(w_ref, b_ref, xt_ref, o_ref, off, width):
    """o[0, off:off+width] = bias + sum_f w[0,f] * xt[f, off:off+width]."""
    acc = jnp.full((1, width), b_ref[0, 0], jnp.float32)      # bias-initialised acc
    for f in range(xt_ref.shape[0]):                          # static unroll, F = 5
        # Ref-indexed row slice: zero-cost view -> strided vload, lane-dense.
        acc = acc + w_ref[0, f] * xt_ref[pl.ds(f, 1), pl.ds(off, width)]
    o_ref[:, pl.ds(off, width)] = acc.astype(o_ref.dtype)


def linear_kernel(w_ref, b_ref, xt_ref, o_ref, *, n_chunks, lane_chunk):
    """w_ref: (1,F) SMEM; b_ref: (1,1) SMEM; xt_ref: (F, tile_b) VMEM (batch on
    lanes); o_ref: (1, tile_b) VMEM lane-dense output row."""
    if n_chunks == 1:
        _fma_row(w_ref, b_ref, xt_ref, o_ref, 0, lane_chunk)
    else:
        def body(c, carry):
            off = pl.multiple_of(c * lane_chunk, lane_chunk)
            _fma_row(w_ref, b_ref, xt_ref, o_ref, off, lane_chunk)
            return carry
        lax.fori_loop(0, n_chunks, body, 0)


def _round_up(n, m):
    return (n + m - 1) // m * m


@jax.jit
def insurance_forward(x, weight, bias):
    """x: (B, F) f32; weight: (OUTPUT_SIZE, F); bias: (OUTPUT_SIZE,) -> (B, 1)."""
    B, F = x.shape

    # Single layout op: put the batch on the lane axis. No padding pass —
    # Pallas masks the ragged last block's out-of-range lanes on writeback.
    xt = x.T.astype(jnp.float32)                                  # (F, B)
    w2 = weight.astype(jnp.float32).reshape(OUTPUT_SIZE, F)       # (1, F) -> SMEM
    b2 = bias.astype(jnp.float32).reshape(1, 1)                   # (1, 1) -> SMEM

    if B <= _SMALL_B:
        # Shipped config (B = 64): one grid step, blocks == full arrays,
        # zero padded bytes, zero pipeline machinery.
        tile_b, lane_chunk, n_chunks = B, B, 1
    else:
        # Large batch: biggest tile that fits scoped VMEM on every gen, while
        # keeping >= 2 grid steps so v7x can shard the loop over its 2 TCs.
        tile_b = min(_MAX_TILE_LANES, _round_up(pl.cdiv(B, 2), _LANE_CHUNK))
        lane_chunk, n_chunks = _LANE_CHUNK, tile_b // _LANE_CHUNK

    num_tiles = pl.cdiv(B, tile_b)
    kernel = functools.partial(linear_kernel, n_chunks=n_chunks,
                               lane_chunk=lane_chunk)

    out_row = pl.pallas_call(
        kernel,
        out_shape=jax.ShapeDtypeStruct((1, B), jnp.float32),
        grid=(num_tiles,),
        in_specs=[
            pl.BlockSpec(memory_space=pltpu.MemorySpace.SMEM),    # weight scalars
            pl.BlockSpec(memory_space=pltpu.MemorySpace.SMEM),    # bias scalar
            pl.BlockSpec((F, tile_b), lambda i: (0, i)),          # batch tile (lanes)
        ],
        out_specs=pl.BlockSpec((1, tile_b), lambda i: (0, i)),    # lane-dense row
        compiler_params=pltpu.CompilerParams(
            dimension_semantics=("parallel",)),                   # shards on v7x 2 TCs
        cost_estimate=pl.CostEstimate(
            flops=2 * B * F,
            transcendentals=0,
            bytes_accessed=B * F * 4 + B * 4 + (F + 1) * 4),
    )(w2, b2, xt)

    # Back to the PyTorch nn.Linear (B, OUTPUT_SIZE) layout (B*4 bytes of plumbing).
    return out_row.reshape(B, OUTPUT_SIZE).astype(x.dtype)


if __name__ == "__main__":
    key = jax.random.PRNGKey(0)
    kx, kw, kb = jax.random.split(key, 3)

    batch_size = 64  # matches the module's batch_size
    x = jax.random.normal(kx, (batch_size, INPUT_SIZE), dtype=jnp.float32)

    # Deterministic nn.Linear-style init: U(-1/sqrt(in), 1/sqrt(in))
    bound = 1.0 / float(INPUT_SIZE) ** 0.5
    weight = jax.random.uniform(kw, (OUTPUT_SIZE, INPUT_SIZE),
                                minval=-bound, maxval=bound, dtype=jnp.float32)
    bias = jax.random.uniform(kb, (OUTPUT_SIZE,),
                              minval=-bound, maxval=bound, dtype=jnp.float32)

    out = jax.block_until_ready(insurance_forward(x, weight, bias))

    # Reference check (plain JAX) of the forward-pass semantics.
    ref = x @ weight.T + bias
    assert out.shape == (batch_size, OUTPUT_SIZE)
    assert jnp.allclose(out, ref, atol=1e-5, rtol=1e-5)

    print("KERNEL_OK")
</pallas_src>

<mosaic_0001>
module attributes {stable_mosaic.version = 11 : i64} {
  func.func @linear_kernel(%arg0: i32, %arg1: memref<1x5xf32, #tpu.memory_space<smem>>, %arg2: memref<1x1xf32, #tpu.memory_space<smem>>, %arg3: memref<5x64xf32, #tpu.memory_space<vmem>>, %arg4: memref<1x64xf32, #tpu.memory_space<vmem>>) attributes {dimension_semantics = [#tpu.dimension_semantics<parallel>], iteration_bounds = array<i64: 1>, scalar_prefetch = 0 : i64, scratch_operands = 0 : i64, tpu.core_type = #tpu.core_type<tc>, window_params = [{transform_indices = @transform_0, window_bounds = array<i64: 1, 5>}, {transform_indices = @transform_1, window_bounds = array<i64: 1, 1>}, {transform_indices = @transform_2, window_bounds = array<i64: 5, 64>}, {transform_indices = @transform_3, window_bounds = array<i64: 1, 64>}]} {
    %c0 = arith.constant 0 : index
    %c0_0 = arith.constant 0 : index
    %0 = memref.load %arg2[%c0, %c0_0] : memref<1x1xf32, #tpu.memory_space<smem>>
    %1 = vector.broadcast %0 : f32 to vector<1x64xf32>
    %c0_1 = arith.constant 0 : index
    %c0_2 = arith.constant 0 : index
    %2 = memref.load %arg1[%c0_1, %c0_2] : memref<1x5xf32, #tpu.memory_space<smem>>
    %c0_3 = arith.constant 0 : index
    %c0_4 = arith.constant 0 : index
    %3 = vector.load %arg3[%c0_3, %c0_4] : memref<5x64xf32, #tpu.memory_space<vmem>>, vector<1x64xf32>
    %4 = vector.broadcast %2 : f32 to vector<1x64xf32>
    %5 = arith.mulf %4, %3 : vector<1x64xf32>
    %6 = arith.addf %1, %5 : vector<1x64xf32>
    %c0_5 = arith.constant 0 : index
    %c1 = arith.constant 1 : index
    %7 = memref.load %arg1[%c0_5, %c1] : memref<1x5xf32, #tpu.memory_space<smem>>
    %c1_6 = arith.constant 1 : index
    %c0_7 = arith.constant 0 : index
    %8 = vector.load %arg3[%c1_6, %c0_7] : memref<5x64xf32, #tpu.memory_space<vmem>>, vector<1x64xf32>
    %9 = vector.broadcast %7 : f32 to vector<1x64xf32>
    %10 = arith.mulf %9, %8 : vector<1x64xf32>
    %11 = arith.addf %6, %10 : vector<1x64xf32>
    %c0_8 = arith.constant 0 : index
    %c2 = arith.constant 2 : index
    %12 = memref.load %arg1[%c0_8, %c2] : memref<1x5xf32, #tpu.memory_space<smem>>
    %c2_9 = arith.constant 2 : index
    %c0_10 = arith.constant 0 : index
    %13 = vector.load %arg3[%c2_9, %c0_10] : memref<5x64xf32, #tpu.memory_space<vmem>>, vector<1x64xf32>
    %14 = vector.broadcast %12 : f32 to vector<1x64xf32>
    %15 = arith.mulf %14, %13 : vector<1x64xf32>
    %16 = arith.addf %11, %15 : vector<1x64xf32>
    %c0_11 = arith.constant 0 : index
    %c3 = arith.constant 3 : index
    %17 = memref.load %arg1[%c0_11, %c3] : memref<1x5xf32, #tpu.memory_space<smem>>
    %c3_12 = arith.constant 3 : index
    %c0_13 = arith.constant 0 : index
    %18 = vector.load %arg3[%c3_12, %c0_13] : memref<5x64xf32, #tpu.memory_space<vmem>>, vector<1x64xf32>
    %19 = vector.broadcast %17 : f32 to vector<1x64xf32>
    %20 = arith.mulf %19, %18 : vector<1x64xf32>
    %21 = arith.addf %16, %20 : vector<1x64xf32>
    %c0_14 = arith.constant 0 : index
    %c4 = arith.constant 4 : index
    %22 = memref.load %arg1[%c0_14, %c4] : memref<1x5xf32, #tpu.memory_space<smem>>
    %c4_15 = arith.constant 4 : index
    %c0_16 = arith.constant 0 : index
    %23 = vector.load %arg3[%c4_15, %c0_16] : memref<5x64xf32, #tpu.memory_space<vmem>>, vector<1x64xf32>
    %24 = vector.broadcast %22 : f32 to vector<1x64xf32>
    %25 = arith.mulf %24, %23 : vector<1x64xf32>
    %26 = arith.addf %21, %25 : vector<1x64xf32>
    %c0_17 = arith.constant 0 : index
    %c0_18 = arith.constant 0 : index
    %27 = vector.load %arg4[%c0_17, %c0_18] : memref<1x64xf32, #tpu.memory_space<vmem>>, vector<1x64xf32>
    tpu.vector_store %arg4[%c0_17, %c0_18], %26 {strides = array<i32>} : memref<1x64xf32, #tpu.memory_space<vmem>>, vector<1x64xf32>,
    return
  }
  func.func @transform_0(%arg0: i32) -> (i32, i32) {
    %c0_i32 = arith.constant 0 : i32
    %c0_i32_0 = arith.constant 0 : i32
    %c0_i32_1 = arith.constant 0 : i32
    return %c0_i32, %c0_i32_0 : i32, i32
  }
  func.func @transform_1(%arg0: i32) -> (i32, i32) {
    %c0_i32 = arith.constant 0 : i32
    %c0_i32_0 = arith.constant 0 : i32
    %c0_i32_1 = arith.constant 0 : i32
    return %c0_i32, %c0_i32_0 : i32, i32
  }
  func.func @transform_2(%arg0: i32) -> (i32, i32) {
    %c0_i32 = arith.constant 0 : i32
    %c0_i32_0 = arith.constant 0 : i32
    return %c0_i32, %arg0 : i32, i32
  }
  func.func @transform_3(%arg0: i32) -> (i32, i32) {
    %c0_i32 = arith.constant 0 : i32
    %c0_i32_0 = arith.constant 0 : i32
    return %c0_i32, %arg0 : i32, i32
  }
}

</mosaic_0001>

<bundles_post_ra>
// kernel: insurance_forward.1
= control target key start
LH: loop header
LB: loop body
LE: loop exit
PB: predicated region body
PF: predicated region fallthrough
CT: control target
= control target key end

     0   :  { %9 = vsyncpa [#allocation5], 0  ;;  %s172_s0 = inlined_call_operand.vmem [shape: f32[1,5], index: 0, kind: input, shape index: {}]   ;;  %s173_s1 = inlined_call_operand.<no memory space> [shape: f32[1,1], index: 1, kind: input, shape index: {}]   ;;  %s174_s2 = inlined_call_operand.vmem [shape: f32[5,64], index: 2, kind: input, shape index: {}]   ;;  %s175_s3 = inlined_call_operand.hbm [shape: f32[1,64], index: 3, kind: output, shape index: {}]  }
   0x1   :  { %10 = vsyncpa [#allocation4], 0  ;;  %s17_s14 = sshll.u32 %s172_s0, 4  ;;  %s18_s14 = int_to_ptr.vmem [resolvable:$true] %s17_s14 }
   0x2   :  { %s79_s15 = scalar_lea.vmem %s18_s14, 16  ;;  %p84_p1 = scmp.lt.s32.totalorder %s18_s14, %s18_s14 }
   0x3   :  { %p80_p0 = scmp.ne.s32.totalorder %s18_s14, %s79_s15  ;;  %p85_p2 = scmp.lt.s32.totalorder %s79_s15, %s79_s15 }
   0x5   :  { %p86_p3 = por %p85_p2, %p84_p1 }
   0x7   :  { %p87_p4 = pnand %p86_p3, %p80_p0 }
   0x9   :  { %90 = shalt.err (!%p87_p4)
}
   0xa   :  { %s117_s16 = smov [#allocation3]  }
   0xb   :  { %20 = dma.vmem_to_smem %s18_s14, 16, %s117_s16, [#allocation5]  }
   0xc   :  { %113 = dma.done.wait [#allocation5], 16  }
   0xd   :  { %114 = vsyncadd [#allocation5], 4294967280 }
   0xe   :  { %28 = sfence }
   0xf   :  { %s31_s17 = sld [smem:[#allocation3]]  ;;  %s73_s18 = sld [smem:[#allocation3 + $0x1]]  ;;  %v32_v0 = vld [vmem:[%s174_s2] sm:$0x1]  ;;  %v37_v1 = vld [vmem:[%s174_s2 + $0x1] sm:$0x1]  ;;  %v30_v2 = vstv %s173_s1 }
  0x10   :  { %s74_s19 = sld [smem:[#allocation3 + $0x2]]  ;;  %s75_s20 = sld [smem:[#allocation3 + $0x3]]  ;;  %v42_v5 = vld [vmem:[%s174_s2 + $0x2] sm:$0x1]  ;;  %v47_v9 = vld [vmem:[%s174_s2 + $0x3] sm:$0x1] }
  0x11   :  { %s76_s21 = sld [smem:[#allocation3 + $0x4]]  ;;  %v52_v13 = vld [vmem:[%s174_s2 + $0x4] sm:$0x1]  ;;  %s118_s1 = smov [#allocation6]   ;;  %vm56_vm0 = vcmask 516096  }
  0x12   :  { %s64_s6 = sshll.u32 %s118_s1, 4  ;;  %s65_s6 = int_to_ptr.vmem [resolvable:$true] %s64_s6 }
  0x13   :  { %s91_s7 = scalar_lea.vmem %s65_s6, 16  ;;  %s95_s8 = scalar_lea.vmem %s65_s6, 32 }
  0x14   :  { %p92_p5 = scmp.ne.s32.totalorder %s65_s6, %s91_s7  ;;  %p96_p6 = scmp.lt.s32.totalorder %s65_s6, %s65_s6 }
  0x15   :  { %v33_v3 = vstv %s31_s17  ;;  %v38_v4 = vstv %s73_s18  ;;  %p97_p7 = scmp.lt.s32.totalorder %s95_s8, %s91_s7 }
  0x16   :  { %v34_v6 = vmul.f32 %v33_v3, %v32_v0  ;;  %v39_v7 = vmul.f32 %v38_v4, %v37_v1  ;;  %v43_v8 = vstv %s74_s19  ;;  %v48_v10 = vstv %s75_s20 }
  0x17   :  { %v44_v12 = vmul.f32 %v43_v8, %v42_v5  ;;  %v53_v14 = vstv %s76_s21  ;;  %v49_v16 = vmul.f32 %v48_v10, %v47_v9  ;;  %p98_p8 = por %p97_p7, %p96_p6 }
  0x18   :  { %v35_v11 = vadd.f32 %v34_v6, %v30_v2  ;;  %v54_v18 = vmul.f32 %v53_v14, %v52_v13 }
  0x19   :  { %p99_p9 = pnand %p98_p8, %p92_p5 }
  0x1a   :  { %v40_v15 = vadd.f32 %v39_v7, %v35_v11 }
  0x1c   :  { %v45_v17 = vadd.f32 %v44_v12, %v40_v15 }
  0x1e   :  { %v50_v19 = vadd.f32 %v49_v16, %v45_v17 }
  0x20   :  { %v55_v20 = vadd.f32 %v54_v18, %v50_v19 }
  0x22   :  { %57 = vst.msk [vmem:[#allocation6] sm:$0x1] %vm56_vm0, %v55_v20 }
  0x23   :  { %102 = shalt.err (!%p99_p9)
}
  0x24   :  { %s103_s10 = scalar_lea.hbm %s175_s3, 16 }
  0x25   :  { %p104_p10 = scmp.ne.s32.totalorder %s175_s3, %s103_s10  ;;  %p107_p11 = scmp.lt.u32.totalorder %s103_s10, %s175_s3 }
  0x27   :  { %p109_p12 = pnand %p107_p11, %p104_p10 }
  0x29   :  { %112 = shalt.err (!%p109_p12)
}
  0x2a   :  { %67 = dma.vmem_to_hbm [thread:$0]  %s65_s6, 16, %s175_s3, [#allocation4]  }
  0x2b   :  { %115 = dma.done.wait [#allocation4], 16  }
  0x2c   :  { %116 = vsyncadd [#allocation4], 4294967280 }
  0x2d   :  { %71 = vsyncpa [#allocation4], 1 }
  0x2e   :  { %72 = vsyncpa [#allocation5], 1 }

</bundles_post_ra>
